<compile_context>
chip_gen: v5e
topology: v5e:2x2
jax: 0.10.0
libtpu: 0.0.40
codegen_flags: <defaults>
</compile_context>

<pallas_src>
import functools

import jax
import jax.numpy as jnp
from jax.experimental import pallas as pl
from jax.experimental.pallas import tpu as pltpu


def _round_up(x, m):
    return ((x + m - 1) // m) * m


def _device_kind():
    try:
        return jax.devices()[0].device_kind.lower()
    except Exception:
        return ""


def _default_num_cores():
    kind = _device_kind()
    # v7x has 2 TensorCores per chip; v5e/v6e have 1.
    return 2 if ("v7" in kind or "7x" in kind) else 1


def _default_budgets():
    """Returns (per-input-block bytes, scoped vmem_limit_bytes) per chip gen."""
    kind = _device_kind()
    if "v6" in kind:
        return 8 << 20, 56 << 20      # 128 MiB physical VMEM, raise scoped limit
    if "v7" in kind or "7x" in kind:
        return 5 << 20, 44 << 20      # only 64 MiB physical per TC -> headroom
    if "v5" in kind:
        return 6 << 20, 40 << 20      # HBM-bound; modest blocks are enough
    return 4 << 20, 40 << 20          # unknown chip: conservative


def _wcl_kernel(o1_ref, o2_ref, lbl_ref, out_ref,
                loss_acc, tp_acc, tn_acc, npos_acc,
                *, n_rows, tb, bpc, margin, w0, w1, masked):
    bi = pl.program_id(1)

    @pl.when(bi == 0)
    def _init():
        loss_acc[...] = jnp.zeros_like(loss_acc)
        tp_acc[...] = jnp.zeros_like(tp_acc)
        tn_acc[...] = jnp.zeros_like(tn_acc)
        npos_acc[...] = jnp.zeros_like(npos_acc)

    o1 = o1_ref[...].astype(jnp.float32)          # (tb, D)
    o2 = o2_ref[...].astype(jnp.float32)          # (tb, D)
    lbl = lbl_ref[...]                            # (tb, 1) float32, 0/1

    # F.pairwise_distance (eps=1e-6): ||x1 - x2 + eps||_2 per row.
    diff = (o1 - o2) + 1e-6
    ssq = jnp.sum(diff * diff, axis=1, keepdims=True)   # (tb, 1) == dist^2
    d = jnp.sqrt(ssq)                                    # needed for the hinge

    # class_weights[label] * ((1-l)*d^2 + l*clamp(margin-d,0)^2)
    hinge = jnp.maximum(margin - d, 0.0)
    w = w0 + (w1 - w0) * lbl
    per_sample = w * ((1.0 - lbl) * ssq + lbl * (hinge * hinge))

    # pred = (d < margin/2)  <=>  ssq < (margin/2)^2   (margin > 0)
    pred = (ssq < (0.5 * margin) ** 2).astype(jnp.float32)
    tp = pred * lbl
    tn = (1.0 - pred) * (1.0 - lbl)
    npos = lbl

    if masked:
        # Grid overruns the batch: zero out rows beyond B (NaN/Inf-safe where).
        g = pl.program_id(0) * bpc + bi          # un-clamped global block index
        row = g * tb + jax.lax.broadcasted_iota(jnp.int32, (tb, 1), 0)
        valid = row < n_rows
        per_sample = jnp.where(valid, per_sample, 0.0)
        tp = jnp.where(valid, tp, 0.0)
        tn = jnp.where(valid, tn, 0.0)
        npos = jnp.where(valid, npos, 0.0)

    # Vector accumulators: pure elementwise per step, reduce once at finalize.
    loss_acc[...] += per_sample
    tp_acc[...] += tp
    tn_acc[...] += tn
    npos_acc[...] += npos

    @pl.when(bi == pl.num_programs(1) - 1)
    def _finalize():
        loss_s = jnp.sum(loss_acc[...])
        tp_s = jnp.sum(tp_acc[...])
        tn_s = jnp.sum(tn_acc[...])
        np_s = jnp.sum(npos_acc[...])
        ridx = jax.lax.broadcasted_iota(jnp.int32, (8, 128), 0)
        blk = jnp.where(ridx == 0, loss_s,
              jnp.where(ridx == 1, tp_s,
              jnp.where(ridx == 2, tn_s,
              jnp.where(ridx == 3, np_s, 0.0))))
        out_ref[...] = blk[None, :, :]


def weighted_contrastive_loss_with_balanced_accuracy(
        output1, output2, label, *, margin=1.0, alpha=0.5,
        class_weights=(1.0, 1.0), num_cores=None,
        target_block_bytes=None, vmem_limit_bytes=None):
    """output1, output2: (B, D); label: (B,) of 0/1. Returns the scalar loss."""
    B, D = output1.shape
    assert output2.shape == (B, D)

    default_blk, default_vmem = _default_budgets()
    if target_block_bytes is None:
        target_block_bytes = default_blk
    if vmem_limit_bytes is None:
        vmem_limit_bytes = default_vmem
    if num_cores is None:
        num_cores = _default_num_cores()

    # Tile rows sized purely by bytes; the 65536 ceiling only bounds the
    # lane-sparse (tb,1) label/accumulator footprint, not streaming throughput.
    itemsize = jnp.dtype(output1.dtype).itemsize
    tb = target_block_bytes // max(D * itemsize, 1)
    tb = int(max(8, min(65536, tb)))
    tb -= tb % 8
    tb = max(tb, 8)
    tb = min(tb, _round_up(B, 8))

    n_blocks = -(-B // tb)
    bpc = -(-n_blocks // num_cores)              # blocks per core
    masked = (num_cores * bpc * tb) != B
    clamp = (num_cores * bpc) > n_blocks         # some cores overrun the blocks

    def in_map(c, i):
        g = c * bpc + i
        if clamp:
            g = jnp.minimum(g, n_blocks - 1)     # keep the DMA in bounds
        return (g, 0)

    lbl2d = label.reshape(B, 1).astype(jnp.float32)

    kernel = functools.partial(
        _wcl_kernel,
        n_rows=B, tb=tb, bpc=bpc, margin=float(margin),
        w0=float(class_weights[0]), w1=float(class_weights[1]), masked=masked)

    partials = pl.pallas_call(
        kernel,
        out_shape=jax.ShapeDtypeStruct((num_cores, 8, 128), jnp.float32),
        grid_spec=pltpu.PrefetchScalarGridSpec(
            num_scalar_prefetch=0,
            grid=(num_cores, bpc),
            in_specs=[
                pl.BlockSpec((tb, D), in_map),
                pl.BlockSpec((tb, D), in_map),
                pl.BlockSpec((tb, 1), in_map),
            ],
            out_specs=pl.BlockSpec((1, 8, 128), lambda c, i: (c, 0, 0)),
            scratch_shapes=[pltpu.VMEM((tb, 1), jnp.float32)] * 4,
        ),
        compiler_params=pltpu.CompilerParams(
            dimension_semantics=("parallel", "arbitrary"),
            vmem_limit_bytes=int(vmem_limit_bytes)),
    )(output1, output2, lbl2d)

    # Scalar epilogue in the wrapper: combine per-core partials.
    parts = partials[:, 0:4, 0]                  # (num_cores, 4)
    totals = jnp.sum(parts, axis=0)              # [loss_sum, tp, tn, n_pos]
    loss_mean = totals[0] * (1.0 / B)
    tp_s, tn_s, np_s = totals[1], totals[2], totals[3]
    fn_s = np_s - tp_s
    fp_s = (B - np_s) - tn_s
    sens = tp_s / (tp_s + fn_s + 1e-8)
    spec = tn_s / (tn_s + fp_s + 1e-8)
    bacc = 0.5 * (sens + spec)
    return alpha * loss_mean - (1.0 - alpha) * bacc


def _reference(output1, output2, label, margin=1.0, alpha=0.5,
               class_weights=(1.0, 1.0)):
    # Pure-JAX mirror of the PyTorch forward.
    o1 = output1.astype(jnp.float32)
    o2 = output2.astype(jnp.float32)
    lbl = label.astype(jnp.float32)
    diff = o1 - o2 + 1e-6
    d = jnp.sqrt(jnp.sum(diff * diff, axis=1))
    w = jnp.where(lbl == 1.0, class_weights[1], class_weights[0])
    loss = jnp.mean(w * ((1 - lbl) * d**2
                         + lbl * jnp.maximum(margin - d, 0.0) ** 2))
    pred = (d < margin / 2).astype(jnp.float32)
    tp = jnp.sum((pred == 1) & (lbl == 1))
    tn = jnp.sum((pred == 0) & (lbl == 0))
    fp = jnp.sum((pred == 1) & (lbl == 0))
    fn = jnp.sum((pred == 0) & (lbl == 1))
    sens = tp / (tp + fn + 1e-8)
    spec = tn / (tn + fp + 1e-8)
    bacc = (sens + spec) / 2
    return alpha * loss - (1 - alpha) * bacc


if __name__ == "__main__":
    key = jax.random.PRNGKey(0)
    k1, k2, k3, k4, k5, k6, k7, k8, k9 = jax.random.split(key, 9)
    D = 32

    # Test 1: default config (auto chip detection), batch divides the tile.
    B = 8
    o1 = jax.random.normal(k1, (B, D), dtype=jnp.float32)
    o2 = jax.random.normal(k2, (B, D), dtype=jnp.float32)
    lbl = jax.random.bernoulli(k3, 0.5, (B,)).astype(jnp.float32)
    got = weighted_contrastive_loss_with_balanced_accuracy(o1, o2, lbl)
    jax.block_until_ready(got)
    want = _reference(o1, o2, lbl)
    assert jnp.allclose(got, want, atol=1e-5), (got, want)

    # Test 2: forced 2-core split, non-divisible batch (mask + clamp paths),
    # non-default class weights.
    B2 = 10
    o1b = jax.random.normal(k4, (B2, D), dtype=jnp.float32)
    o2b = jax.random.normal(k5, (B2, D), dtype=jnp.float32)
    lblb = jax.random.bernoulli(k6, 0.5, (B2,)).astype(jnp.float32)
    cw = (0.75, 1.25)
    got2 = weighted_contrastive_loss_with_balanced_accuracy(
        o1b, o2b, lblb, class_weights=cw, num_cores=2)
    jax.block_until_ready(got2)
    want2 = _reference(o1b, o2b, lblb, class_weights=cw)
    assert jnp.allclose(got2, want2, atol=1e-5), (got2, want2)

    # Test 3: multi-block accumulation per core (tiny forced tile) with a
    # partial last block, 2-core split.
    B3 = 60
    o1c = jax.random.normal(k7, (B3, D), dtype=jnp.float32)
    o2c = jax.random.normal(k8, (B3, D), dtype=jnp.float32)
    lblc = jax.random.bernoulli(k9, 0.5, (B3,)).astype(jnp.float32)
    got3 = weighted_contrastive_loss_with_balanced_accuracy(
        o1c, o2c, lblc, class_weights=cw, num_cores=2,
        target_block_bytes=1024)
    jax.block_until_ready(got3)
    want3 = _reference(o1c, o2c, lblc, class_weights=cw)
    assert jnp.allclose(got3, want3, atol=1e-5), (got3, want3)

    print("KERNEL_OK")
</pallas_src>

<mosaic_0001>
module attributes {stable_mosaic.version = 11 : i64} {
  func.func @_wcl_kernel(%arg0: i32, %arg1: i32, %arg2: memref<8x32xf32, #tpu.memory_space<vmem>>, %arg3: memref<8x32xf32, #tpu.memory_space<vmem>>, %arg4: memref<8x1xf32, #tpu.memory_space<vmem>>, %arg5: memref<1x8x128xf32, #tpu.memory_space<vmem>>, %arg6: memref<8x1xf32, #tpu.memory_space<vmem>>, %arg7: memref<8x1xf32, #tpu.memory_space<vmem>>, %arg8: memref<8x1xf32, #tpu.memory_space<vmem>>, %arg9: memref<8x1xf32, #tpu.memory_space<vmem>>) attributes {dimension_semantics = [#tpu.dimension_semantics<parallel>, #tpu.dimension_semantics<arbitrary>], iteration_bounds = array<i64: 1, 1>, scalar_prefetch = 0 : i64, scratch_operands = 4 : i64, tpu.core_type = #tpu.core_type<tc>, window_params = [{transform_indices = @transform_0, window_bounds = array<i64: 8, 32>}, {transform_indices = @transform_1, window_bounds = array<i64: 8, 32>}, {transform_indices = @transform_2, window_bounds = array<i64: 8, 1>}, {transform_indices = @transform_3, window_bounds = array<i64: 1, 8, 128>}]} {
    %c0_i32 = arith.constant 0 : i32
    %0 = arith.cmpi eq, %arg1, %c0_i32 : i32
    %1 = arith.extui %0 : i1 to i32
    %c0_i32_0 = arith.constant 0 : i32
    %2 = arith.cmpi ne, %1, %c0_i32_0 : i32
    scf.if %2 {
      %cst_33 = arith.constant 0.000000e+00 : f32
      %53 = vector.broadcast %cst_33 : f32 to vector<8x1xf32>
      %c0_34 = arith.constant 0 : index
      %c0_35 = arith.constant 0 : index
      %54 = vector.load %arg6[%c0_34, %c0_35] : memref<8x1xf32, #tpu.memory_space<vmem>>, vector<8x1xf32>
      tpu.vector_store %arg6[%c0_34, %c0_35], %53 {strides = array<i32>} : memref<8x1xf32, #tpu.memory_space<vmem>>, vector<8x1xf32>,
      %cst_36 = arith.constant 0.000000e+00 : f32
      %55 = vector.broadcast %cst_36 : f32 to vector<8x1xf32>
      %c0_37 = arith.constant 0 : index
      %c0_38 = arith.constant 0 : index
      %56 = vector.load %arg7[%c0_37, %c0_38] : memref<8x1xf32, #tpu.memory_space<vmem>>, vector<8x1xf32>
      tpu.vector_store %arg7[%c0_37, %c0_38], %55 {strides = array<i32>} : memref<8x1xf32, #tpu.memory_space<vmem>>, vector<8x1xf32>,
      %cst_39 = arith.constant 0.000000e+00 : f32
      %57 = vector.broadcast %cst_39 : f32 to vector<8x1xf32>
      %c0_40 = arith.constant 0 : index
      %c0_41 = arith.constant 0 : index
      %58 = vector.load %arg8[%c0_40, %c0_41] : memref<8x1xf32, #tpu.memory_space<vmem>>, vector<8x1xf32>
      tpu.vector_store %arg8[%c0_40, %c0_41], %57 {strides = array<i32>} : memref<8x1xf32, #tpu.memory_space<vmem>>, vector<8x1xf32>,
      %cst_42 = arith.constant 0.000000e+00 : f32
      %59 = vector.broadcast %cst_42 : f32 to vector<8x1xf32>
      %c0_43 = arith.constant 0 : index
      %c0_44 = arith.constant 0 : index
      %60 = vector.load %arg9[%c0_43, %c0_44] : memref<8x1xf32, #tpu.memory_space<vmem>>, vector<8x1xf32>
      tpu.vector_store %arg9[%c0_43, %c0_44], %59 {strides = array<i32>} : memref<8x1xf32, #tpu.memory_space<vmem>>, vector<8x1xf32>,
    } else {
    }
    %c0 = arith.constant 0 : index
    %c0_1 = arith.constant 0 : index
    %3 = vector.load %arg2[%c0, %c0_1] : memref<8x32xf32, #tpu.memory_space<vmem>>, vector<8x32xf32>
    %c0_2 = arith.constant 0 : index
    %c0_3 = arith.constant 0 : index
    %4 = vector.load %arg3[%c0_2, %c0_3] : memref<8x32xf32, #tpu.memory_space<vmem>>, vector<8x32xf32>
    %c0_4 = arith.constant 0 : index
    %c0_5 = arith.constant 0 : index
    %5 = vector.load %arg4[%c0_4, %c0_5] : memref<8x1xf32, #tpu.memory_space<vmem>>, vector<8x1xf32>
    %6 = arith.subf %3, %4 : vector<8x32xf32>
    %cst = arith.constant 9.99999997E-7 : f32
    %7 = vector.broadcast %cst : f32 to vector<8x32xf32>
    %8 = arith.addf %6, %7 : vector<8x32xf32>
    %9 = arith.mulf %8, %8 : vector<8x32xf32>
    %cst_6 = arith.constant dense<0.000000e+00> : vector<8xf32>
    %10 = vector.multi_reduction <add>, %9, %cst_6 [1] : vector<8x32xf32> to vector<8xf32>
    %11 = vector.shape_cast %10 : vector<8xf32> to vector<8x1xf32>
    %12 = math.sqrt %11 : vector<8x1xf32>
    %cst_7 = arith.constant 1.000000e+00 : f32
    %13 = vector.broadcast %cst_7 : f32 to vector<8x1xf32>
    %14 = arith.subf %13, %12 : vector<8x1xf32>
    %cst_8 = arith.constant 0.000000e+00 : f32
    %15 = vector.broadcast %cst_8 : f32 to vector<8x1xf32>
    %16 = arith.maximumf %14, %15 : vector<8x1xf32>
    %cst_9 = arith.constant 0.000000e+00 : f32
    %17 = vector.broadcast %cst_9 : f32 to vector<8x1xf32>
    %18 = arith.mulf %17, %5 : vector<8x1xf32>
    %cst_10 = arith.constant 1.000000e+00 : f32
    %19 = vector.broadcast %cst_10 : f32 to vector<8x1xf32>
    %20 = arith.addf %19, %18 : vector<8x1xf32>
    %cst_11 = arith.constant 1.000000e+00 : f32
    %21 = vector.broadcast %cst_11 : f32 to vector<8x1xf32>
    %22 = arith.subf %21, %5 : vector<8x1xf32>
    %23 = arith.mulf %22, %11 : vector<8x1xf32>
    %24 = arith.mulf %16, %16 : vector<8x1xf32>
    %25 = arith.mulf %5, %24 : vector<8x1xf32>
    %26 = arith.addf %23, %25 : vector<8x1xf32>
    %27 = arith.mulf %20, %26 : vector<8x1xf32>
    %cst_12 = arith.constant 2.500000e-01 : f32
    %28 = vector.broadcast %cst_12 : f32 to vector<8x1xf32>
    %29 = arith.cmpf olt, %11, %28 : vector<8x1xf32>
    %30 = arith.extui %29 : vector<8x1xi1> to vector<8x1xi32>
    %31 = arith.sitofp %30 : vector<8x1xi32> to vector<8x1xf32>
    %32 = arith.mulf %31, %5 : vector<8x1xf32>
    %cst_13 = arith.constant 1.000000e+00 : f32
    %33 = vector.broadcast %cst_13 : f32 to vector<8x1xf32>
    %34 = arith.subf %33, %31 : vector<8x1xf32>
    %cst_14 = arith.constant 1.000000e+00 : f32
    %35 = vector.broadcast %cst_14 : f32 to vector<8x1xf32>
    %36 = arith.subf %35, %5 : vector<8x1xf32>
    %37 = arith.mulf %34, %36 : vector<8x1xf32>
    %c0_15 = arith.constant 0 : index
    %c0_16 = arith.constant 0 : index
    %38 = vector.load %arg6[%c0_15, %c0_16] : memref<8x1xf32, #tpu.memory_space<vmem>>, vector<8x1xf32>
    %39 = arith.addf %38, %27 : vector<8x1xf32>
    %c0_17 = arith.constant 0 : index
    %c0_18 = arith.constant 0 : index
    %40 = vector.load %arg6[%c0_17, %c0_18] : memref<8x1xf32, #tpu.memory_space<vmem>>, vector<8x1xf32>
    tpu.vector_store %arg6[%c0_17, %c0_18], %39 {strides = array<i32>} : memref<8x1xf32, #tpu.memory_space<vmem>>, vector<8x1xf32>,
    %c0_19 = arith.constant 0 : index
    %c0_20 = arith.constant 0 : index
    %41 = vector.load %arg7[%c0_19, %c0_20] : memref<8x1xf32, #tpu.memory_space<vmem>>, vector<8x1xf32>
    %42 = arith.addf %41, %32 : vector<8x1xf32>
    %c0_21 = arith.constant 0 : index
    %c0_22 = arith.constant 0 : index
    %43 = vector.load %arg7[%c0_21, %c0_22] : memref<8x1xf32, #tpu.memory_space<vmem>>, vector<8x1xf32>
    tpu.vector_store %arg7[%c0_21, %c0_22], %42 {strides = array<i32>} : memref<8x1xf32, #tpu.memory_space<vmem>>, vector<8x1xf32>,
    %c0_23 = arith.constant 0 : index
    %c0_24 = arith.constant 0 : index
    %44 = vector.load %arg8[%c0_23, %c0_24] : memref<8x1xf32, #tpu.memory_space<vmem>>, vector<8x1xf32>
    %45 = arith.addf %44, %37 : vector<8x1xf32>
    %c0_25 = arith.constant 0 : index
    %c0_26 = arith.constant 0 : index
    %46 = vector.load %arg8[%c0_25, %c0_26] : memref<8x1xf32, #tpu.memory_space<vmem>>, vector<8x1xf32>
    tpu.vector_store %arg8[%c0_25, %c0_26], %45 {strides = array<i32>} : memref<8x1xf32, #tpu.memory_space<vmem>>, vector<8x1xf32>,
    %c0_27 = arith.constant 0 : index
    %c0_28 = arith.constant 0 : index
    %47 = vector.load %arg9[%c0_27, %c0_28] : memref<8x1xf32, #tpu.memory_space<vmem>>, vector<8x1xf32>
    %48 = arith.addf %47, %5 : vector<8x1xf32>
    %c0_29 = arith.constant 0 : index
    %c0_30 = arith.constant 0 : index
    %49 = vector.load %arg9[%c0_29, %c0_30] : memref<8x1xf32, #tpu.memory_space<vmem>>, vector<8x1xf32>
    tpu.vector_store %arg9[%c0_29, %c0_30], %48 {strides = array<i32>} : memref<8x1xf32, #tpu.memory_space<vmem>>, vector<8x1xf32>,
    %c0_i32_31 = arith.constant 0 : i32
    %50 = arith.cmpi eq, %arg1, %c0_i32_31 : i32
    %51 = arith.extui %50 : i1 to i32
    %c0_i32_32 = arith.constant 0 : i32
    %52 = arith.cmpi ne, %51, %c0_i32_32 : i32
    scf.if %52 {
      %c0_33 = arith.constant 0 : index
      %c0_34 = arith.constant 0 : index
      %53 = vector.load %arg6[%c0_33, %c0_34] : memref<8x1xf32, #tpu.memory_space<vmem>>, vector<8x1xf32>
      %54 = vector.shape_cast %53 : vector<8x1xf32> to vector<1x8x1xf32>
      %cst_35 = arith.constant dense<0.000000e+00> : vector<1xf32>
      %55 = vector.multi_reduction <add>, %54, %cst_35 [1, 2] : vector<1x8x1xf32> to vector<1xf32>
      %56 = vector.shape_cast %55 : vector<1xf32> to vector<1x1x1xf32>
      %57 = vector.extract %56[0, 0, 0] : f32 from vector<1x1x1xf32>
      %c0_36 = arith.constant 0 : index
      %c0_37 = arith.constant 0 : index
      %58 = vector.load %arg7[%c0_36, %c0_37] : memref<8x1xf32, #tpu.memory_space<vmem>>, vector<8x1xf32>
      %59 = vector.shape_cast %58 : vector<8x1xf32> to vector<1x8x1xf32>
      %cst_38 = arith.constant dense<0.000000e+00> : vector<1xf32>
      %60 = vector.multi_reduction <add>, %59, %cst_38 [1, 2] : vector<1x8x1xf32> to vector<1xf32>
      %61 = vector.shape_cast %60 : vector<1xf32> to vector<1x1x1xf32>
      %62 = vector.extract %61[0, 0, 0] : f32 from vector<1x1x1xf32>
      %c0_39 = arith.constant 0 : index
      %c0_40 = arith.constant 0 : index
      %63 = vector.load %arg8[%c0_39, %c0_40] : memref<8x1xf32, #tpu.memory_space<vmem>>, vector<8x1xf32>
      %64 = vector.shape_cast %63 : vector<8x1xf32> to vector<1x8x1xf32>
      %cst_41 = arith.constant dense<0.000000e+00> : vector<1xf32>
      %65 = vector.multi_reduction <add>, %64, %cst_41 [1, 2] : vector<1x8x1xf32> to vector<1xf32>
      %66 = vector.shape_cast %65 : vector<1xf32> to vector<1x1x1xf32>
      %67 = vector.extract %66[0, 0, 0] : f32 from vector<1x1x1xf32>
      %c0_42 = arith.constant 0 : index
      %c0_43 = arith.constant 0 : index
      %68 = vector.load %arg9[%c0_42, %c0_43] : memref<8x1xf32, #tpu.memory_space<vmem>>, vector<8x1xf32>
      %69 = vector.shape_cast %68 : vector<8x1xf32> to vector<1x8x1xf32>
      %cst_44 = arith.constant dense<0.000000e+00> : vector<1xf32>
      %70 = vector.multi_reduction <add>, %69, %cst_44 [1, 2] : vector<1x8x1xf32> to vector<1xf32>
      %71 = vector.shape_cast %70 : vector<1xf32> to vector<1x1x1xf32>
      %72 = vector.extract %71[0, 0, 0] : f32 from vector<1x1x1xf32>
      %73 = tpu.iota {dimensions = array<i32: 0>} : vector<8x128xi32>
      %c0_i32_45 = arith.constant 0 : i32
      %74 = vector.broadcast %c0_i32_45 : i32 to vector<8x128xi32>
      %75 = arith.cmpi eq, %73, %74 : vector<8x128xi32>
      %c1_i32 = arith.constant 1 : i32
      %76 = vector.broadcast %c1_i32 : i32 to vector<8x128xi32>
      %77 = arith.cmpi eq, %73, %76 : vector<8x128xi32>
      %c2_i32 = arith.constant 2 : i32
      %78 = vector.broadcast %c2_i32 : i32 to vector<8x128xi32>
      %79 = arith.cmpi eq, %73, %78 : vector<8x128xi32>
      %c3_i32 = arith.constant 3 : i32
      %80 = vector.broadcast %c3_i32 : i32 to vector<8x128xi32>
      %81 = arith.cmpi eq, %73, %80 : vector<8x128xi32>
      %cst_46 = arith.constant 0.000000e+00 : f32
      %82 = vector.broadcast %72 : f32 to vector<8x128xf32>
      %83 = vector.broadcast %cst_46 : f32 to vector<8x128xf32>
      %84 = arith.select %81, %82, %83 : vector<8x128xi1>, vector<8x128xf32>
      %85 = vector.broadcast %67 : f32 to vector<8x128xf32>
      %86 = arith.select %79, %85, %84 : vector<8x128xi1>, vector<8x128xf32>
      %87 = vector.broadcast %62 : f32 to vector<8x128xf32>
      %88 = arith.select %77, %87, %86 : vector<8x128xi1>, vector<8x128xf32>
      %89 = vector.broadcast %57 : f32 to vector<8x128xf32>
      %90 = arith.select %75, %89, %88 : vector<8x128xi1>, vector<8x128xf32>
      %91 = vector.shape_cast %90 : vector<8x128xf32> to vector<1x8x128xf32>
      %c0_47 = arith.constant 0 : index
      %c0_48 = arith.constant 0 : index
      %c0_49 = arith.constant 0 : index
      %92 = vector.load %arg5[%c0_47, %c0_48, %c0_49] : memref<1x8x128xf32, #tpu.memory_space<vmem>>, vector<1x8x128xf32>
      tpu.vector_store %arg5[%c0_47, %c0_48, %c0_49], %91 {strides = array<i32>} : memref<1x8x128xf32, #tpu.memory_space<vmem>>, vector<1x8x128xf32>,
    } else {
    }
    return
  }
  func.func @transform_0(%arg0: i32, %arg1: i32) -> (i32, i32) {
    %c1_i32 = arith.constant 1 : i32
    %0 = arith.muli %arg0, %c1_i32 : i32
    %1 = arith.addi %0, %arg1 : i32
    %c0_i32 = arith.constant 0 : i32
    %c0_i32_0 = arith.constant 0 : i32
    return %1, %c0_i32 : i32, i32
  }
  func.func @transform_1(%arg0: i32, %arg1: i32) -> (i32, i32) {
    %c1_i32 = arith.constant 1 : i32
    %0 = arith.muli %arg0, %c1_i32 : i32
    %1 = arith.addi %0, %arg1 : i32
    %c0_i32 = arith.constant 0 : i32
    %c0_i32_0 = arith.constant 0 : i32
    return %1, %c0_i32 : i32, i32
  }
  func.func @transform_2(%arg0: i32, %arg1: i32) -> (i32, i32) {
    %c1_i32 = arith.constant 1 : i32
    %0 = arith.muli %arg0, %c1_i32 : i32
    %1 = arith.addi %0, %arg1 : i32
    %c0_i32 = arith.constant 0 : i32
    %c0_i32_0 = arith.constant 0 : i32
    return %1, %c0_i32 : i32, i32
  }
  func.func @transform_3(%arg0: i32, %arg1: i32) -> (i32, i32, i32) {
    %c0_i32 = arith.constant 0 : i32
    %c0_i32_0 = arith.constant 0 : i32
    %c0_i32_1 = arith.constant 0 : i32
    return %arg0, %c0_i32, %c0_i32_0 : i32, i32, i32
  }
}

</mosaic_0001>

<bundles_post_ra>
// kernel: tpu_custom_call.1
= control target key start
LH: loop header
LB: loop body
LE: loop exit
PB: predicated region body
PF: predicated region fallthrough
CT: control target
= control target key end

     0   :  { %8 = vsyncpa [#allocation7], 0  ;;  %s331_s0 = inlined_call_operand.vmem [shape: f32[8,32], index: 0, kind: input, shape index: {}]   ;;  %s332_s1 = inlined_call_operand.hbm [shape: f32[8,32], index: 1, kind: input, shape index: {}]   ;;  %s333_s2 = inlined_call_operand.vmem [shape: f32[8,1], index: 2, kind: input, shape index: {}]   ;;  %s334_s3 = inlined_call_operand.hbm [shape: f32[1,8,128], index: 3, kind: output, shape index: {}]  }
   0x1   :  { %9 = vsyncpa [#allocation8], 0  ;;  %s26_s14 = sshll.u32 %s332_s1, 4  ;;  %s284_s15 = smov [#allocation6]   ;;  %s27_s14 = int_to_ptr.hbm [resolvable:$true] %s26_s14 }
   0x2   :  { %s28_s16 = sshll.u32 %s284_s15, 4  ;;  %s29_s16 = int_to_ptr.vmem [resolvable:$true] %s28_s16 }
   0x3   :  { %31 = dma.hbm_to_vmem [thread:$0]  %s27_s14, 128, %s29_s16, [#allocation7]  }
   0x4   :  { %280 = dma.done.wait [#allocation7], 128  }
   0x5   :  { %281 = vsyncadd [#allocation7], 4294967168  ;;  %vm71_vm0 = vcmask 7168   ;;  %v285_v0 = vmov 0.0   ;;  %v76_v1 = vld [vmem:[%s331_s0] sm:$0xff]  ;;  %vm82_vm1 = vcmask 261120  }
   0x6   :  { %72 = vst.msk [vmem:[#allocation2] sm:$0xff] %vm71_vm0, %v285_v0  ;;  %v77_v2 = vld [vmem:[#allocation6] sm:$0xff]  ;;  %s286_s22 = smov [#allocation9]   ;;  %s196_s26 = sshll.u32 %s334_s3, 4  ;;  %s197_s26 = int_to_ptr.hbm [resolvable:$true] %s196_s26 }
   0x7   :  { %73 = vst.msk [vmem:[#allocation3] sm:$0xff] %vm71_vm0, %v285_v0  ;;  %v79_v3 = vsub.f32 %v76_v1, %v77_v2  ;;  %v78_v7 = vld [vmem:[%s333_s2] sm:$0xff]  ;;  %s194_s23 = sshll.u32 %s286_s22, 4  ;;  %s195_s23 = int_to_ptr.vmem [resolvable:$true] %s194_s23 }
   0x8   :  { %74 = vst.msk [vmem:[#allocation4] sm:$0xff] %vm71_vm0, %v285_v0  ;;  %v102_v13 = vsub.f32 1.0, %v78_v7  ;;  %v100_v36 = vmul.f32 0.0, %v78_v7 }
   0x9   :  { %75 = vst.msk [vmem:[#allocation5] sm:$0xff] %vm71_vm0, %v285_v0  ;;  %v80_v4 = vadd.f32 1e-06, %v79_v3 }
   0xa   :  { %v101_v40 = vadd.f32 1.0, %v100_v36 }
   0xb   :  { %v81_v5 = vmul.f32 %v80_v4, %v80_v4 }
   0xd   :  { %v83_v6 = vsel %vm82_vm1, %v81_v5, 0.0  ;;  %v114_v44 = vld [vmem:[#allocation2] sm:$0xff] }
   0xe   :  { %84 = vadd.xlane.f32.xlu0 %v83_v6  ;;  %v118_v12 = vld [vmem:[#allocation3] sm:$0xff] }
   0xf   :  { %v121_v16 = vld [vmem:[#allocation4] sm:$0xff] }
  0x10   :  { %v124_v8 = vld [vmem:[#allocation5] sm:$0xff] }
  0x11   :  { %v125_v9 = vadd.f32 %v124_v8, %v78_v7 }
  0x13   :  { %126 = vst.msk [vmem:[#allocation5] sm:$0xff] %vm71_vm0, %v125_v9 }
  0x1a   :  { %v163_v19 = vld [vmem:[#allocation5] sm:$0xff] }
  0x1b   :  { %v164_v21 = vsel %vm71_vm0, %v163_v19, 0.0 }
  0x1c   :  { %165 = vadd.xlane.f32.xlu2 %v164_v21 }
  0x81   :  { %v85_v10 = vpop.xlane.xlu0 %84 }
  0x82   :  { %230 = vrsqrt.f32 %v85_v10  ;;  %vm108_vm2 = vcmp.lt.f32.partialorder %v85_v10, 0.25  ;;  %vm93_vm3 = vcmp.eq.f32.partialorder %v85_v10, inf  ;;  %v96_v31 = vand.u32 2147483648, %v85_v10 }
  0x83   :  { %v218_v11 = vsel %vm108_vm2, 1.0, %v285_v0  ;;  %vm95_vm4 = vcmp.eq.f32.partialorder %v85_v10, 0.0  ;;  %v103_v41 = vmul.f32 %v102_v13, %v85_v10 }
  0x84   :  { %v111_v14 = vmul.f32 %v218_v11, %v78_v7  ;;  %v112_v15 = vsub.f32 1.0, %v218_v11 }
  0x86   :  { %v113_v17 = vmul.f32 %v112_v15, %v102_v13  ;;  %v119_v18 = vadd.f32 %v118_v12, %v111_v14  ;;  %v174_v13 = vlaneseq }
  0x88   :  { %v231_v20 = vpop.eup %230  ;;  %v122_v23 = vadd.f32 %v121_v16, %v113_v17  ;;  %120 = vst.msk [vmem:[#allocation3] sm:$0xff] %vm71_vm0, %v119_v18  ;;  %v175_v14 = vshrl.u32 %v174_v13, 7 }
  0x89   :  { %v87_v22 = vmul.f32 %v231_v20, %v85_v10 }
  0x8a   :  { %123 = vst.msk [vmem:[#allocation4] sm:$0xff] %vm71_vm0, %v122_v23  ;;  %vm179_vm5 = vcmp.eq.s32.totalorder %v175_v14, 3  ;;  %vm178_vm6 = vcmp.eq.s32.totalorder %v175_v14, 2  ;;  %vm177_vm7 = vcmp.eq.s32.totalorder %v175_v14, 1  ;;  %vm176_vm8 = vcmp.eq.s32.totalorder %v175_v14, 0 }
  0x8b   :  { %v88_v24 = vmul.f32 %v231_v20, %v87_v22 }
  0x8d   :  { %v89_v25 = vmul.f32 0.5, %v88_v24 }
  0x8f   :  { %v90_v26 = vsub.f32 1.5, %v89_v25  ;;  %v141_v27 = vld [vmem:[#allocation3] sm:$0xff]  ;;  %v166_v51 = vpop.xlane.xlu2 %165 }
  0x90   :  { %v142_v29 = vsel %vm71_vm0, %v141_v27, 0.0  ;;  %v167_v54 = vrot.slane %v166_v51, 4 }
  0x91   :  { %v91_v28 = vmul.f32 %v231_v20, %v90_v26  ;;  %143 = vadd.xlane.f32.xlu1 %v142_v29  ;;  %v152_v34 = vld [vmem:[#allocation4] sm:$0xff] }
  0x92   :  { %v153_v38 = vsel %vm71_vm0, %v152_v34, 0.0  ;;  %v168_v57 = vadd.f32 %v167_v54, %v166_v51 }
  0x93   :  { %v92_v30 = vmul.f32 %v91_v28, %v85_v10 }
  0x94   :  { %v169_v62 = vrot.slane %v168_v57, 2 }
  0x95   :  { %v94_v32 = vsel %vm93_vm3, %v85_v10, %v92_v30 }
  0x96   :  { %v97_v33 = vsel %vm95_vm4, %v96_v31, %v94_v32  ;;  %v170_v3 = vadd.f32 %v169_v62, %v168_v57 }
  0x97   :  { %v98_v35 = vsub.f32 1.0, %v97_v33 }
  0x98   :  { %v171_v8 = vrot.slane %v170_v3, 1 }
  0x99   :  { %v99_v37 = vmax.f32 %v98_v35, 0.0  ;;  %154 = vadd.xlane.f32.xlu1 %v153_v38 }
  0x9a   :  { %v172_v12 = vadd.f32 %v171_v8, %v170_v3 }
  0x9b   :  { %v104_v39 = vmul.f32 %v99_v37, %v99_v37 }
  0x9d   :  { %v105_v42 = vmul.f32 %v104_v39, %v78_v7 }
  0x9f   :  { %v106_v43 = vadd.f32 %v105_v42, %v103_v41 }
  0xa1   :  { %v107_v45 = vmul.f32 %v106_v43, %v101_v40 }
  0xa3   :  { %v115_v46 = vadd.f32 %v114_v44, %v107_v45 }
  0xa5   :  { %117 = vst.msk [vmem:[#allocation2] sm:$0xff] %vm71_vm0, %v115_v46 }
  0xac   :  { %v130_v47 = vld [vmem:[#allocation2] sm:$0xff] }
  0xad   :  { %v131_v48 = vsel %vm71_vm0, %v130_v47, 0.0 }
  0xae   :  { %132 = vadd.xlane.f32.xlu0 %v131_v48 }
 0x104   :  { %v144_v49 = vpop.xlane.xlu1 %143 }
 0x105   :  { %v145_v52 = vrot.slane %v144_v49, 4 }
 0x107   :  { %v146_v55 = vadd.f32 %v145_v52, %v144_v49 }
 0x109   :  { %v147_v58 = vrot.slane %v146_v55, 2 }
 0x10b   :  { %v148_v0 = vadd.f32 %v147_v58, %v146_v55 }
 0x10c   :  { %v155_v50 = vpop.xlane.xlu1 %154 }
 0x10d   :  { %v156_v53 = vrot.slane %v155_v50, 4  ;;  %v149_v5 = vrot.slane %v148_v0, 1 }
 0x10f   :  { %v157_v56 = vadd.f32 %v156_v53, %v155_v50  ;;  %v150_v10 = vadd.f32 %v149_v5, %v148_v0 }
 0x111   :  { %v158_v60 = vrot.slane %v157_v56, 2 }
 0x113   :  { %v159_v1 = vadd.f32 %v158_v60, %v157_v56 }
 0x115   :  { %v160_v7 = vrot.slane %v159_v1, 1 }
 0x117   :  { %v161_v11 = vadd.f32 %v160_v7, %v159_v1 }
 0x121   :  { %v133_v59 = vpop.xlane.xlu0 %132 }
 0x122   :  { %v134_v61 = vrot.slane %v133_v59, 4 }
 0x124   :  { %v135_v63 = vadd.f32 %v134_v61, %v133_v59 }
 0x126   :  { %v136_v2 = vrot.slane %v135_v63, 2 }
 0x128   :  { %v137_v4 = vadd.f32 %v136_v2, %v135_v63 }
 0x12a   :  { %v138_v6 = vrot.slane %v137_v4, 1 }
 0x12c   :  { %v139_v9 = vadd.f32 %v138_v6, %v137_v4 }
 0x12e   :  { %219 = vpush %v139_v9 }
 0x12f   :  { %221 = vpush %v150_v10 }
 0x130   :  { %223 = vpush %v161_v11 }
 0x131   :  { %225 = vpush %v172_v12 }
 0x15f   :  { %s220_s0 = spop %219 }
 0x160   :  { %s222_s2 = spop %221  ;;  %v186_v20 = vstv %s220_s0 }
 0x161   :  { %s224_s20 = spop %223  ;;  %v184_v18 = vstv %s222_s2 }
 0x162   :  { %v182_v15 = vstv %s224_s20  ;;  %s226_s21 = spop %225 }
 0x163   :  { %v180_v16 = vstv %s226_s21 }
 0x164   :  { %v181_v17 = vsel %vm179_vm5, %v180_v16, 0.0 }
 0x165   :  { %v183_v19 = vsel %vm178_vm6, %v182_v15, %v181_v17 }
 0x166   :  { %v185_v21 = vsel %vm177_vm7, %v184_v18, %v183_v19 }
 0x167   :  { %v187_v22 = vsel %vm176_vm8, %v186_v20, %v185_v21 }
 0x168   :  { %188 = vst [vmem:[#allocation9] sm:$0xff] %v187_v22 }
 0x169   :  { %199 = dma.vmem_to_hbm [thread:$0]  %s195_s23, 128, %s197_s26, [#allocation8]  }
 0x16a   :  { %282 = dma.done.wait [#allocation8], 128  }
 0x16b   :  { %283 = vsyncadd [#allocation8], 4294967168 }
 0x16c   :  { %204 = vsyncpa [#allocation7], 1 }
 0x16d   :  { %205 = vsyncpa [#allocation8], 1 }

</bundles_post_ra>
